<compile_context>
chip_gen: v5e
topology: v5e:2x2
jax: 0.10.0
libtpu: 0.0.40
codegen_flags: <defaults>
</compile_context>

<pallas_src>
import functools

import numpy as np
import jax
import jax.numpy as jnp
from jax.experimental import pallas as pl


# ----------------------------- fused Pallas kernel ---------------------------

def make_fused_kernel(n_layers, n_mats):
    """Build the fused GNN kernel.

    Ref layout (all full-array VMEM views, no grid):
      refs = (h, G, S, w0_l0, b0_l0, ..., w_{n_mats-1}_l0, b_..., <layer 1>,
              ..., out)
    """

    def kernel(*refs):
        h_ref, g_ref, s_ref = refs[0], refs[1], refs[2]
        out_ref = refs[-1]
        wb = refs[3:-1]

        G = g_ref[...]                                  # [N*F, B*2F]
        S = s_ref[...]                                  # [B*O, N*O]
        h = h_ref[...]                                  # [T, N*F]

        idx = 0
        for _ in range(n_layers):
            # gather: cat([h[dst], h[src]]) for every MLP block (pairs + fixed)
            x = jnp.dot(h, G, preferred_element_type=jnp.float32)  # [T, B*2F]
            # block-diagonal batched MLP, SiLU on all but the last layer
            for m in range(n_mats):
                w = wb[idx][...]                        # [B*d_in, B*d_out]
                b = wb[idx + 1][...]                    # [1, B*d_out]
                idx += 2
                x = jnp.dot(x, w, preferred_element_type=jnp.float32) + b
                if m < n_mats - 1:
                    x = x * jax.nn.sigmoid(x)           # SiLU / swish
            # signed aggregation == cat([eff, -eff, fixed]) + copy_e/sum at dst
            h = jnp.dot(x, S, preferred_element_type=jnp.float32)  # [T, N*O]

        out_ref[...] = h.astype(out_ref.dtype)

    return kernel


def rel_mot_gnn_fused(h, G, S, flat_wb, *, n_layers, n_mats, n_nodes, out_feats):
    """h: [T, N, F] -> [T, N, out_feats], whole network in one pallas_call."""
    T, N, F = h.shape
    h_flat = h.reshape(T, N * F)
    kernel = make_fused_kernel(n_layers, n_mats)
    out = pl.pallas_call(
        kernel,
        out_shape=jax.ShapeDtypeStruct((T, n_nodes * out_feats), jnp.float32),
    )(h_flat, G, S, *flat_wb)
    return out.reshape(T, n_nodes, out_feats)


# --------------------- static graph constants (host, numpy) ------------------

def build_gather_matrix(src, dst, n_pairs, n_nodes, feats):
    """G [N*feats, (P+1)*2*feats]: H_flat @ G == per-block cat([h[dst], h[src]]).

    Block b < P uses edge b (forward pair edge); block P uses the last edge
    (the 'fixed' edge), matching effective_e = e[:E//2], fixed_e = e[[-1]].
    """
    E = len(src)
    B = n_pairs + 1
    G = np.zeros((n_nodes * feats, B * 2 * feats), np.float32)
    block_edges = list(range(n_pairs)) + [E - 1]
    for b, k in enumerate(block_edges):
        d, s = int(dst[k]), int(src[k])
        for j in range(feats):
            G[d * feats + j, b * 2 * feats + j] = 1.0
            G[s * feats + j, b * 2 * feats + feats + j] = 1.0
    return jnp.asarray(G)


def build_signed_incidence(src, dst, n_pairs, n_nodes, out_feats):
    """S [(P+1)*O, N*O]: Y_packed @ S == scatter-sum of [eff, -eff, fixed] at dst.

    +1 for the forward pair edge b (dst[b]), -1 for its reversed edge b+P
    (dst[b+P]), +1 for the fixed (last) edge at its dst node.
    """
    E = len(src)
    S = np.zeros(((n_pairs + 1) * out_feats, n_nodes * out_feats), np.float32)
    for b in range(n_pairs):
        d_fwd = int(dst[b])
        d_rev = int(dst[b + n_pairs])
        for j in range(out_feats):
            S[b * out_feats + j, d_fwd * out_feats + j] += 1.0
            S[b * out_feats + j, d_rev * out_feats + j] -= 1.0
    d_fix = int(dst[E - 1])
    for j in range(out_feats):
        S[n_pairs * out_feats + j, d_fix * out_feats + j] += 1.0
    return jnp.asarray(S)


# --------------------------- parameter construction --------------------------

def xavier_normal(key, shape):
    fan_in, fan_out = shape[-2], shape[-1]
    std = (2.0 / (fan_in + fan_out)) ** 0.5
    return std * jax.random.normal(key, shape, jnp.float32)


def init_layer_params(key, n_pairs, in_feats, out_feats, mlp_feats, mlp_layers):
    dims = ([(in_feats * 2, mlp_feats)]
            + [(mlp_feats, mlp_feats)] * mlp_layers
            + [(mlp_feats, out_feats)])
    keys = jax.random.split(key, 2 * len(dims))
    w_int = [xavier_normal(keys[2 * i], (n_pairs,) + d) for i, d in enumerate(dims)]
    w_fix = [xavier_normal(keys[2 * i + 1], (1,) + d) for i, d in enumerate(dims)]
    # biases are zero-initialized in the reference module (only weights get xavier)
    b_int = [jnp.zeros((n_pairs, 1, d[1]), jnp.float32) for d in dims]
    b_fix = [jnp.zeros((1, 1, d[1]), jnp.float32) for d in dims]
    return dict(w_int=w_int, b_int=b_int, w_fix=w_fix, b_fix=b_fix)


def pack_layer_block_diag(params):
    """Pack per-block MLP params into block-diagonal weights + flat biases.

    Blocks = [interactive pair 0..P-1, fixed]; weight l -> [B*d_in, B*d_out],
    bias l -> [1, B*d_out].  Done once on the host (static graph/params).
    """
    packed = []
    n_mats = len(params["w_int"])
    for i in range(n_mats):
        blocks = np.concatenate(
            [np.asarray(params["w_int"][i]), np.asarray(params["w_fix"][i])], axis=0)
        B, di, do = blocks.shape
        w_bd = np.zeros((B * di, B * do), np.float32)
        for b in range(B):
            w_bd[b * di:(b + 1) * di, b * do:(b + 1) * do] = blocks[b]
        bias = np.concatenate(
            [np.asarray(params["b_int"][i]), np.asarray(params["b_fix"][i])], axis=0)
        packed.append(jnp.asarray(w_bd))
        packed.append(jnp.asarray(bias.reshape(1, B * do)))
    return packed


# ------------------------------ pure-JAX reference ---------------------------

def _mlp_ref(x, ws, bs):
    h = x
    for i, (w, b) in enumerate(zip(ws, bs)):
        h = jnp.einsum("btd,bde->bte", h, w) + b
        if i < len(ws) - 1:
            h = jax.nn.silu(h)
    return h


def rel_mot_gnn_ref(h, layer_params, src, dst, n_pairs, n_nodes):
    h = jnp.transpose(h, (1, 0, 2))                              # [N, T, F]
    for params in layer_params:
        e = jnp.concatenate([h[dst], h[src]], axis=-1)           # [E, T, 2F]
        eff = _mlp_ref(e[:n_pairs], params["w_int"], params["b_int"])
        fix = _mlp_ref(e[-1:], params["w_fix"], params["b_fix"])
        e_all = jnp.concatenate([eff, -eff, fix], axis=0)        # [E, T, O]
        T, O = e_all.shape[1], e_all.shape[2]
        h = jnp.zeros((n_nodes, T, O), e_all.dtype).at[dst].add(e_all)
    return jnp.transpose(h, (1, 0, 2))


# ------------------------------------ main ------------------------------------

if __name__ == "__main__":
    # 5-DOF chain graph: 4 bidirectional "spring" edge pairs between neighbour
    # masses + 1 "fixed" (ground) self-loop edge on node 0 -> 9 edges.
    # Edge ordering (assumed by the PyTorch module too):
    #   edges 0..P-1: forward pair edges, P..2P-1: reversed pairs, 2P: fixed.
    n_nodes = 5
    src_pairs = np.array([0, 1, 2, 3], np.int32)
    dst_pairs = np.array([1, 2, 3, 4], np.int32)
    src = np.concatenate([src_pairs, dst_pairs, np.array([0], np.int32)])
    dst = np.concatenate([dst_pairs, src_pairs, np.array([0], np.int32)])
    n_pairs = 4

    in_feats, out_feats, mlp_feats, mlp_layers, n_layers = 4, 4, 32, 1, 2
    assert n_layers == 1 or in_feats == out_feats  # required by the module itself
    T = 16  # time-steps (leading dim of the module's input)

    key = jax.random.PRNGKey(0)
    k_h, *k_layers = jax.random.split(key, n_layers + 1)
    layer_params = [
        init_layer_params(k, n_pairs, in_feats, out_feats, mlp_feats, mlp_layers)
        for k in k_layers
    ]

    # static, host-side constants (graph is fixed)
    G = build_gather_matrix(src, dst, n_pairs, n_nodes, in_feats)
    S = build_signed_incidence(src, dst, n_pairs, n_nodes, out_feats)
    flat_wb = [a for p in layer_params for a in pack_layer_block_diag(p)]
    n_mats = mlp_layers + 2

    h = jax.random.normal(k_h, (T, n_nodes, in_feats), jnp.float32)

    fwd = jax.jit(functools.partial(
        rel_mot_gnn_fused, n_layers=n_layers, n_mats=n_mats,
        n_nodes=n_nodes, out_feats=out_feats))
    out = jax.block_until_ready(fwd(h, G, S, flat_wb))

    ref = rel_mot_gnn_ref(h, layer_params, jnp.asarray(dst) * 0 + jnp.asarray(dst),
                          jnp.asarray(src), n_pairs, n_nodes)
    # (note: ref signature is (h, params, src, dst, ...) -- call it properly)
    ref = rel_mot_gnn_ref(h, layer_params, jnp.asarray(src), jnp.asarray(dst),
                          n_pairs, n_nodes)
    assert out.shape == (T, n_nodes, out_feats), out.shape
    np.testing.assert_allclose(np.asarray(out), np.asarray(ref),
                               rtol=1e-4, atol=1e-4)
    print("KERNEL_OK")
</pallas_src>

<mosaic_0001>
module attributes {stable_mosaic.version = 11 : i64} {
  func.func @kernel(%arg0: memref<16x20xf32, #tpu.memory_space<vmem>>, %arg1: memref<20x40xf32, #tpu.memory_space<vmem>>, %arg2: memref<20x20xf32, #tpu.memory_space<vmem>>, %arg3: memref<40x160xf32, #tpu.memory_space<vmem>>, %arg4: memref<1x160xf32, #tpu.memory_space<vmem>>, %arg5: memref<160x160xf32, #tpu.memory_space<vmem>>, %arg6: memref<1x160xf32, #tpu.memory_space<vmem>>, %arg7: memref<160x20xf32, #tpu.memory_space<vmem>>, %arg8: memref<1x20xf32, #tpu.memory_space<vmem>>, %arg9: memref<40x160xf32, #tpu.memory_space<vmem>>, %arg10: memref<1x160xf32, #tpu.memory_space<vmem>>, %arg11: memref<160x160xf32, #tpu.memory_space<vmem>>, %arg12: memref<1x160xf32, #tpu.memory_space<vmem>>, %arg13: memref<160x20xf32, #tpu.memory_space<vmem>>, %arg14: memref<1x20xf32, #tpu.memory_space<vmem>>, %arg15: memref<16x20xf32, #tpu.memory_space<vmem>>) attributes {dimension_semantics = [], scalar_prefetch = 0 : i64, scratch_operands = 0 : i64, tpu.core_type = #tpu.core_type<tc>} {
    %c0 = arith.constant 0 : index
    %c0_0 = arith.constant 0 : index
    %0 = vector.load %arg1[%c0, %c0_0] : memref<20x40xf32, #tpu.memory_space<vmem>>, vector<20x40xf32>
    %c0_1 = arith.constant 0 : index
    %c0_2 = arith.constant 0 : index
    %1 = vector.load %arg2[%c0_1, %c0_2] : memref<20x20xf32, #tpu.memory_space<vmem>>, vector<20x20xf32>
    %c0_3 = arith.constant 0 : index
    %c0_4 = arith.constant 0 : index
    %2 = vector.load %arg0[%c0_3, %c0_4] : memref<16x20xf32, #tpu.memory_space<vmem>>, vector<16x20xf32>
    %cst = arith.constant dense<0.000000e+00> : vector<16x40xf32>
    %3 = tpu.matmul %2, %0, %cst {dimension_numbers = #tpu.dot_dimension_numbers<[1], [0], [0], [1], [0, 0, 1, 1], [], []>} : vector<16x20xf32>, vector<20x40xf32>, vector<16x40xf32> -> vector<16x40xf32>
    %c0_5 = arith.constant 0 : index
    %c0_6 = arith.constant 0 : index
    %4 = vector.load %arg3[%c0_5, %c0_6] : memref<40x160xf32, #tpu.memory_space<vmem>>, vector<40x160xf32>
    %c0_7 = arith.constant 0 : index
    %c0_8 = arith.constant 0 : index
    %5 = vector.load %arg4[%c0_7, %c0_8] : memref<1x160xf32, #tpu.memory_space<vmem>>, vector<1x160xf32>
    %cst_9 = arith.constant dense<0.000000e+00> : vector<16x160xf32>
    %6 = tpu.matmul %3, %4, %cst_9 {dimension_numbers = #tpu.dot_dimension_numbers<[1], [0], [0], [1], [0, 0, 1, 1], [], []>} : vector<16x40xf32>, vector<40x160xf32>, vector<16x160xf32> -> vector<16x160xf32>
    %7 = vector.broadcast %5 : vector<1x160xf32> to vector<16x160xf32>
    %8 = arith.addf %6, %7 : vector<16x160xf32>
    %9 = arith.negf %8 : vector<16x160xf32>
    %10 = math.exp %9 : vector<16x160xf32>
    %cst_10 = arith.constant 1.000000e+00 : f32
    %11 = vector.broadcast %cst_10 : f32 to vector<16x160xf32>
    %12 = arith.addf %11, %10 : vector<16x160xf32>
    %13 = arith.divf %11, %12 : vector<16x160xf32>
    %14 = arith.mulf %8, %13 : vector<16x160xf32>
    %c0_11 = arith.constant 0 : index
    %c0_12 = arith.constant 0 : index
    %15 = vector.load %arg5[%c0_11, %c0_12] : memref<160x160xf32, #tpu.memory_space<vmem>>, vector<160x160xf32>
    %c0_13 = arith.constant 0 : index
    %c0_14 = arith.constant 0 : index
    %16 = vector.load %arg6[%c0_13, %c0_14] : memref<1x160xf32, #tpu.memory_space<vmem>>, vector<1x160xf32>
    %cst_15 = arith.constant dense<0.000000e+00> : vector<16x160xf32>
    %17 = tpu.matmul %14, %15, %cst_15 {dimension_numbers = #tpu.dot_dimension_numbers<[1], [0], [0], [1], [0, 0, 1, 1], [], []>} : vector<16x160xf32>, vector<160x160xf32>, vector<16x160xf32> -> vector<16x160xf32>
    %18 = vector.broadcast %16 : vector<1x160xf32> to vector<16x160xf32>
    %19 = arith.addf %17, %18 : vector<16x160xf32>
    %20 = arith.negf %19 : vector<16x160xf32>
    %21 = math.exp %20 : vector<16x160xf32>
    %cst_16 = arith.constant 1.000000e+00 : f32
    %22 = vector.broadcast %cst_16 : f32 to vector<16x160xf32>
    %23 = arith.addf %22, %21 : vector<16x160xf32>
    %24 = arith.divf %22, %23 : vector<16x160xf32>
    %25 = arith.mulf %19, %24 : vector<16x160xf32>
    %c0_17 = arith.constant 0 : index
    %c0_18 = arith.constant 0 : index
    %26 = vector.load %arg7[%c0_17, %c0_18] : memref<160x20xf32, #tpu.memory_space<vmem>>, vector<160x20xf32>
    %c0_19 = arith.constant 0 : index
    %c0_20 = arith.constant 0 : index
    %27 = vector.load %arg8[%c0_19, %c0_20] : memref<1x20xf32, #tpu.memory_space<vmem>>, vector<1x20xf32>
    %cst_21 = arith.constant dense<0.000000e+00> : vector<16x20xf32>
    %28 = tpu.matmul %25, %26, %cst_21 {dimension_numbers = #tpu.dot_dimension_numbers<[1], [0], [0], [1], [0, 0, 1, 1], [], []>} : vector<16x160xf32>, vector<160x20xf32>, vector<16x20xf32> -> vector<16x20xf32>
    %29 = vector.broadcast %27 : vector<1x20xf32> to vector<16x20xf32>
    %30 = arith.addf %28, %29 : vector<16x20xf32>
    %cst_22 = arith.constant dense<0.000000e+00> : vector<16x20xf32>
    %31 = tpu.matmul %30, %1, %cst_22 {dimension_numbers = #tpu.dot_dimension_numbers<[1], [0], [0], [1], [0, 0, 1, 1], [], []>} : vector<16x20xf32>, vector<20x20xf32>, vector<16x20xf32> -> vector<16x20xf32>
    %cst_23 = arith.constant dense<0.000000e+00> : vector<16x40xf32>
    %32 = tpu.matmul %31, %0, %cst_23 {dimension_numbers = #tpu.dot_dimension_numbers<[1], [0], [0], [1], [0, 0, 1, 1], [], []>} : vector<16x20xf32>, vector<20x40xf32>, vector<16x40xf32> -> vector<16x40xf32>
    %c0_24 = arith.constant 0 : index
    %c0_25 = arith.constant 0 : index
    %33 = vector.load %arg9[%c0_24, %c0_25] : memref<40x160xf32, #tpu.memory_space<vmem>>, vector<40x160xf32>
    %c0_26 = arith.constant 0 : index
    %c0_27 = arith.constant 0 : index
    %34 = vector.load %arg10[%c0_26, %c0_27] : memref<1x160xf32, #tpu.memory_space<vmem>>, vector<1x160xf32>
    %cst_28 = arith.constant dense<0.000000e+00> : vector<16x160xf32>
    %35 = tpu.matmul %32, %33, %cst_28 {dimension_numbers = #tpu.dot_dimension_numbers<[1], [0], [0], [1], [0, 0, 1, 1], [], []>} : vector<16x40xf32>, vector<40x160xf32>, vector<16x160xf32> -> vector<16x160xf32>
    %36 = vector.broadcast %34 : vector<1x160xf32> to vector<16x160xf32>
    %37 = arith.addf %35, %36 : vector<16x160xf32>
    %38 = arith.negf %37 : vector<16x160xf32>
    %39 = math.exp %38 : vector<16x160xf32>
    %cst_29 = arith.constant 1.000000e+00 : f32
    %40 = vector.broadcast %cst_29 : f32 to vector<16x160xf32>
    %41 = arith.addf %40, %39 : vector<16x160xf32>
    %42 = arith.divf %40, %41 : vector<16x160xf32>
    %43 = arith.mulf %37, %42 : vector<16x160xf32>
    %c0_30 = arith.constant 0 : index
    %c0_31 = arith.constant 0 : index
    %44 = vector.load %arg11[%c0_30, %c0_31] : memref<160x160xf32, #tpu.memory_space<vmem>>, vector<160x160xf32>
    %c0_32 = arith.constant 0 : index
    %c0_33 = arith.constant 0 : index
    %45 = vector.load %arg12[%c0_32, %c0_33] : memref<1x160xf32, #tpu.memory_space<vmem>>, vector<1x160xf32>
    %cst_34 = arith.constant dense<0.000000e+00> : vector<16x160xf32>
    %46 = tpu.matmul %43, %44, %cst_34 {dimension_numbers = #tpu.dot_dimension_numbers<[1], [0], [0], [1], [0, 0, 1, 1], [], []>} : vector<16x160xf32>, vector<160x160xf32>, vector<16x160xf32> -> vector<16x160xf32>
    %47 = vector.broadcast %45 : vector<1x160xf32> to vector<16x160xf32>
    %48 = arith.addf %46, %47 : vector<16x160xf32>
    %49 = arith.negf %48 : vector<16x160xf32>
    %50 = math.exp %49 : vector<16x160xf32>
    %cst_35 = arith.constant 1.000000e+00 : f32
    %51 = vector.broadcast %cst_35 : f32 to vector<16x160xf32>
    %52 = arith.addf %51, %50 : vector<16x160xf32>
    %53 = arith.divf %51, %52 : vector<16x160xf32>
    %54 = arith.mulf %48, %53 : vector<16x160xf32>
    %c0_36 = arith.constant 0 : index
    %c0_37 = arith.constant 0 : index
    %55 = vector.load %arg13[%c0_36, %c0_37] : memref<160x20xf32, #tpu.memory_space<vmem>>, vector<160x20xf32>
    %c0_38 = arith.constant 0 : index
    %c0_39 = arith.constant 0 : index
    %56 = vector.load %arg14[%c0_38, %c0_39] : memref<1x20xf32, #tpu.memory_space<vmem>>, vector<1x20xf32>
    %cst_40 = arith.constant dense<0.000000e+00> : vector<16x20xf32>
    %57 = tpu.matmul %54, %55, %cst_40 {dimension_numbers = #tpu.dot_dimension_numbers<[1], [0], [0], [1], [0, 0, 1, 1], [], []>} : vector<16x160xf32>, vector<160x20xf32>, vector<16x20xf32> -> vector<16x20xf32>
    %58 = vector.broadcast %56 : vector<1x20xf32> to vector<16x20xf32>
    %59 = arith.addf %57, %58 : vector<16x20xf32>
    %cst_41 = arith.constant dense<0.000000e+00> : vector<16x20xf32>
    %60 = tpu.matmul %59, %1, %cst_41 {dimension_numbers = #tpu.dot_dimension_numbers<[1], [0], [0], [1], [0, 0, 1, 1], [], []>} : vector<16x20xf32>, vector<20x20xf32>, vector<16x20xf32> -> vector<16x20xf32>
    %c0_42 = arith.constant 0 : index
    %c0_43 = arith.constant 0 : index
    %61 = vector.load %arg15[%c0_42, %c0_43] : memref<16x20xf32, #tpu.memory_space<vmem>>, vector<16x20xf32>
    tpu.vector_store %arg15[%c0_42, %c0_43], %60 {strides = array<i32>} : memref<16x20xf32, #tpu.memory_space<vmem>>, vector<16x20xf32>,
    return
  }
}

</mosaic_0001>

<bundles_post_ra>
// kernel: rel_mot_gnn_fused.1
= control target key start
LH: loop header
LB: loop body
LE: loop exit
PB: predicated region body
PF: predicated region fallthrough
CT: control target
= control target key end

     0   :  { %20 = vsyncpa [#allocation3], 0  ;;  %s1897_s0 = inlined_call_operand.vmem [shape: f32[16,20], index: 0, kind: input, shape index: {}]   ;;  %s1898_s1 = inlined_call_operand.hbm [shape: f32[20,40], index: 1, kind: input, shape index: {}]   ;;  %s1899_s2 = inlined_call_operand.hbm [shape: f32[20,20], index: 2, kind: input, shape index: {}]   ;;  %s1900_s3 = inlined_call_operand.vmem [shape: f32[40,160], index: 3, kind: input, shape index: {}]   ;;  %s1901_s4 = inlined_call_operand.vmem [shape: f32[1,160], index: 4, kind: input, shape index: {}]   ;;  %s1902_s5 = inlined_call_operand.vmem [shape: f32[160,160], index: 5, kind: input, shape index: {}]   ;;  %s1903_s6 = inlined_call_operand.vmem [shape: f32[1,160], index: 6, kind: input, shape index: {}]   ;;  %s1904_s7 = inlined_call_operand.vmem [shape: f32[160,20], index: 7, kind: input, shape index: {}]   ;;  %s1905_s8 = inlined_call_operand.vmem [shape: f32[1,20], index: 8, kind: input, shape index: {}]   ;;  %s1906_s9 = inlined_call_operand.hbm [shape: f32[40,160], index: 9, kind: input, shape index: {}]   ;;  %s1907_s10 = inlined_call_operand.vmem [shape: f32[1,160], index: 10, kind: input, shape index: {}]   ;;  %s1908_s11 = inlined_call_operand.hbm [shape: f32[160,160], index: 11, kind: input, shape index: {}]   ;;  %s1909_s12 = inlined_call_operand.vmem [shape: f32[1,160], index: 12, kind: input, shape index: {}]   ;;  %s1910_s13 = inlined_call_operand.vmem [shape: f32[160,20], index: 13, kind: input, shape index: {}]   ;;  %s1911_s14 = inlined_call_operand.vmem [shape: f32[1,20], index: 14, kind: input, shape index: {}]   ;;  %s1912_s15 = inlined_call_operand.vmem [shape: f32[16,20], index: 15, kind: output, shape index: {}]  }
   0x1   :  { %21 = vsyncpa [#allocation5], 0 }
   0x2   :  { %22 = vsyncpa [#allocation8], 0  ;;  %s42_s20 = sshll.u32 %s1899_s2, 4  ;;  %s1379_s21 = smov [#allocation4]   ;;  %s43_s20 = int_to_ptr.hbm [resolvable:$true] %s42_s20 }
   0x3   :  { %s44_s22 = sshll.u32 %s1379_s21, 4  ;;  %s29_s25 = sshll.u32 %s1898_s1, 4  ;;  %s45_s22 = int_to_ptr.vmem [resolvable:$true] %s44_s22  ;;  %s30_s25 = int_to_ptr.hbm [resolvable:$true] %s29_s25 }
   0x4   :  { %s1380_s26 = smov 128   ;;  %s1381_s27 = smov 8  }
   0x5   :  { %50 = dma.hbm_to_vmem [thread:$0]  %s43_s20, 384, %s45_s22, [#allocation5], %s1380_s26, %s1380_s26, %s1381_s27  }
   0x6   :  { %s1382_s28 = smov [#allocation2]   ;;  %s67_s17 = sshll.u32 %s1906_s9, 4  ;;  %s68_s17 = int_to_ptr.hbm [resolvable:$true] %s67_s17 }
   0x7   :  { %s31_s29 = sshll.u32 %s1382_s28, 4  ;;  %s1383_s2 = smov [#allocation6]   ;;  %s32_s29 = int_to_ptr.vmem [resolvable:$true] %s31_s29 }
   0x8   :  { %37 = dma.hbm_to_vmem [thread:$0]  %s30_s25, 384, %s32_s29, [#allocation3], %s1380_s26, %s1380_s26, %s1381_s27  }
   0x9   :  { %s69_s18 = sshll.u32 %s1383_s2, 4  ;;  %s82_s1 = sshll.u32 %s1908_s11, 4  ;;  %s70_s18 = int_to_ptr.vmem [resolvable:$true] %s69_s18  ;;  %s83_s1 = int_to_ptr.hbm [resolvable:$true] %s82_s1 }
   0xa   :  { %s1384_s23 = smov 256   ;;  %s1385_s24 = smov 16  }
   0xb   :  { %75 = dma.hbm_to_vmem [thread:$0]  %s68_s17, 1280, %s70_s18, [#allocation5], %s1384_s23, %s1384_s23, %s1385_s24  }
   0xc   :  { %s1386_s20 = smov [#allocation7]  }
   0xd   :  { %s84_s22 = sshll.u32 %s1386_s20, 4  ;;  %s85_s22 = int_to_ptr.vmem [resolvable:$true] %s84_s22 }
   0xe   :  { %90 = dma.hbm_to_vmem [thread:$0]  %s83_s1, 5120, %s85_s22, [#allocation8], %s1384_s23, %s1384_s23, %s1385_s24  }
   0xf   :  { %1373 = dma.done.wait [#allocation3], 384  }
  0x10   :  { %1374 = vsyncadd [#allocation3], 4294966912 }
  0x11   :  { %1375 = dma.done.wait [#allocation5], 1664  }
  0x12   :  { %1376 = vsyncadd [#allocation5], 4294965632 }
  0x13   :  { %1377 = dma.done.wait [#allocation8], 5120  }
  0x14   :  { %1378 = vsyncadd [#allocation8], 4294962176  ;;  %vm128_vm0 = vcmask 1043456   ;;  %v1479_v0 = vld [vmem:[#allocation2 + $0x10] sm:$0xf]  ;;  %v1481_v1 = vld [vmem:[#allocation2 + $0x8] sm:$0xff] }
  0x15   :  { %1152 = vmatpush.msk.msra.mxu0 %vm128_vm0, %v1479_v0  ;;  %v1485_v2 = vld [vmem:[#allocation2] sm:$0xff]  ;;  %v164_v4 = vld [vmem:[%s1900_s3 + $0x48] sm:$0xff]  ;;  %v161_v5 = vld [vmem:[%s1900_s3 + $0x30] sm:$0xff]  ;;  %vm121_vm1 = vcmask 162816   ;;  %vm171_vm2 = vcmask 326656   ;;  %vm350_vm12 = vcmask 261120  }
  0x16   :  { %v163_v3 = vld [vmem:[%s1900_s3 + $0x40] sm:$0xff]  ;;  %v162_v6 = vld [vmem:[%s1900_s3 + $0x38] sm:$0xff]  ;;  %212 = vmatpush.msra.mxu2 %v164_v4  ;;  %v160_v9 = vld [vmem:[%s1900_s3 + $0x28] sm:$0xff] }
  0x17   :  { %189 = vmatpush.msra.mxu1 %v163_v3  ;;  %146 = vmatpush.msra.mxu0 %v1481_v1  ;;  %v119_v7 = vld [vmem:[%s1897_s0] sm:$0xff]  ;;  %v157_v10 = vld [vmem:[%s1900_s3 + $0x10] sm:$0xff]  ;;  %v158_v11 = vld [vmem:[%s1900_s3 + $0x18] sm:$0xff] }
  0x18   :  { %v159_v8 = vld [vmem:[%s1900_s3 + $0x20] sm:$0xff]  ;;  %213 = vmatpush.msra.mxu2 %v162_v6  ;;  %v120_v12 = vld [vmem:[%s1897_s0 + $0x8] sm:$0xff]  ;;  %v334_v17 = vld [vmem:[%s1902_s5 + $0xf0] sm:$0xff] }
  0x19   :  { %190 = vmatpush.msra.mxu1 %v161_v5  ;;  %147 = vmatpush.msra.mxu0 %v1485_v2  ;;  %v155_v13 = vld [vmem:[%s1900_s3] sm:$0xff]  ;;  %v156_v14 = vld [vmem:[%s1900_s3 + $0x8] sm:$0xff]  ;;  %v335_v18 = vld [vmem:[%s1902_s5 + $0xf8] sm:$0xff] }
  0x1a   :  { %1153 = vmatmul.msk.f32.vlgmr.msra.gmra.mxu0 %vm121_vm1, %v119_v7  ;;  %214 = vmatpush.msra.mxu2 %v160_v9  ;;  %v332_v19 = vld [vmem:[%s1902_s5 + $0xe0] sm:$0xff]  ;;  %v333_v20 = vld [vmem:[%s1902_s5 + $0xe8] sm:$0xff]  ;;  %v330_v21 = vld [vmem:[%s1902_s5 + $0xd0] sm:$0xff] }
  0x1b   :  { %191 = vmatpush.msra.mxu1 %v159_v8  ;;  %357 = vmatpush.msra.mxu3 %v334_v17  ;;  %v331_v22 = vld [vmem:[%s1902_s5 + $0xd8] sm:$0xff]  ;;  %v328_v23 = vld [vmem:[%s1902_s5 + $0xc0] sm:$0xff]  ;;  %v329_v24 = vld [vmem:[%s1902_s5 + $0xc8] sm:$0xff] }
  0x1c   :  { %215 = vmatpush.msra.mxu2 %v158_v11  ;;  %v326_v25 = vld [vmem:[%s1902_s5 + $0xb0] sm:$0xff]  ;;  %v327_v26 = vld [vmem:[%s1902_s5 + $0xb8] sm:$0xff]  ;;  %v324_v27 = vld [vmem:[%s1902_s5 + $0xa0] sm:$0xff] }
  0x1d   :  { %192 = vmatpush.msra.mxu1 %v157_v10  ;;  %358 = vmatpush.msra.mxu3 %v332_v19  ;;  %v325_v28 = vld [vmem:[%s1902_s5 + $0xa8] sm:$0xff]  ;;  %v322_v29 = vld [vmem:[%s1902_s5 + $0x90] sm:$0xff]  ;;  %v323_v30 = vld [vmem:[%s1902_s5 + $0x98] sm:$0xff] }
  0x1e   :  { %216 = vmatpush.msra.mxu2 %v156_v14  ;;  %v320_v31 = vld [vmem:[%s1902_s5 + $0x80] sm:$0xff]  ;;  %v321_v32 = vld [vmem:[%s1902_s5 + $0x88] sm:$0xff]  ;;  %v318_v33 = vld [vmem:[%s1902_s5 + $0x70] sm:$0xff] }
  0x1f   :  { %193 = vmatpush.msra.mxu1 %v155_v13  ;;  %359 = vmatpush.msra.mxu3 %v330_v21  ;;  %v319_v34 = vld [vmem:[%s1902_s5 + $0x78] sm:$0xff]  ;;  %v316_v35 = vld [vmem:[%s1902_s5 + $0x60] sm:$0xff]  ;;  %v317_v36 = vld [vmem:[%s1902_s5 + $0x68] sm:$0xff] }
  0x20   :  { %v314_v37 = vld [vmem:[%s1902_s5 + $0x50] sm:$0xff]  ;;  %v315_v38 = vld [vmem:[%s1902_s5 + $0x58] sm:$0xff]  ;;  %v312_v39 = vld [vmem:[%s1902_s5 + $0x40] sm:$0xff] }
  0x21   :  { %403 = vmatpush.msrb.mxu1 %v335_v18  ;;  %360 = vmatpush.msra.mxu3 %v328_v23  ;;  %v313_v40 = vld [vmem:[%s1902_s5 + $0x48] sm:$0xff]  ;;  %v165_v41 = vld [vmem:[%s1901_s4] sm:$0x3]  ;;  %v310_v42 = vld [vmem:[%s1902_s5 + $0x30] sm:$0xff] }
  0x22   :  { %1154 = vmatmul.msk.f32.gmra.mxu0 %vm121_vm1, %v120_v12  ;;  %v311_v43 = vld [vmem:[%s1902_s5 + $0x38] sm:$0xff]  ;;  %v308_v44 = vld [vmem:[%s1902_s5 + $0x20] sm:$0xff]  ;;  %v309_v45 = vld [vmem:[%s1902_s5 + $0x28] sm:$0xff]  ;;  %v167_v46 = vperm.slane %v165_v41, 0  ;;  %v168_v58 = vperm.slane %v165_v41, 1 }
  0x23   :  { %404 = vmatpush.msrb.mxu1 %v333_v20  ;;  %361 = vmatpush.msra.mxu3 %v326_v25  ;;  %v306_v47 = vld [vmem:[%s1902_s5 + $0x10] sm:$0xff]  ;;  %v307_v48 = vld [vmem:[%s1902_s5 + $0x18] sm:$0xff]  ;;  %v304_v51 = vld [vmem:[%s1902_s5] sm:$0xff] }
  0x24   :  { %v343_v50 = vld [vmem:[%s1902_s5 + $0x138] sm:$0xff]  ;;  %v342_v52 = vld [vmem:[%s1902_s5 + $0x130] sm:$0xff]  ;;  %v305_v54 = vld [vmem:[%s1902_s5 + $0x8] sm:$0xff] }
  0x25   :  { %405 = vmatpush.msrb.mxu1 %v331_v22  ;;  %362 = vmatpush.msra.mxu3 %v324_v27  ;;  %v341_v55 = vld [vmem:[%s1902_s5 + $0x128] sm:$0xff]  ;;  %v340_v56 = vld [vmem:[%s1902_s5 + $0x120] sm:$0xff]  ;;  %v339_v59 = vld [vmem:[%s1902_s5 + $0x118] sm:$0xff] }
  0x26   :  { %438 = vmatpush.msrb.mxu2 %v343_v50  ;;  %392 = vmatpush.msrb.mxu0 %v342_v52  ;;  %v338_v60 = vld [vmem:[%s1902_s5 + $0x110] sm:$0xff]  ;;  %v337_v62 = vld [vmem:[%s1902_s5 + $0x108] sm:$0xff]  ;;  %v336_v63 = vld [vmem:[%s1902_s5 + $0x100] sm:$0xff] }
  0x27   :  { %406 = vmatpush.msrb.mxu1 %v329_v24  ;;  %363 = vmatpush.msra.mxu3 %v322_v29 }
  0x28   :  { %439 = vmatpush.msrb.mxu2 %v341_v55  ;;  %393 = vmatpush.msrb.mxu0 %v340_v56 }
  0x29   :  { %407 = vmatpush.msrb.mxu1 %v327_v26  ;;  %364 = vmatpush.msra.mxu3 %v320_v31 }
  0x2a   :  { %440 = vmatpush.msrb.mxu2 %v339_v59  ;;  %394 = vmatpush.msrb.mxu0 %v338_v60 }
  0x2b   :  { %408 = vmatpush.msrb.mxu1 %v325_v28  ;;  %365 = vmatpush.msra.mxu3 %v318_v33 }
  0x2c   :  { %441 = vmatpush.msrb.mxu2 %v337_v62  ;;  %395 = vmatpush.msrb.mxu0 %v336_v63  ;;  %v544_v63 = vld [vmem:[%s1904_s7 + $0x78] sm:$0xff] }
  0x2d   :  { %409 = vmatpush.msrb.mxu1 %v323_v30  ;;  %366 = vmatpush.msra.mxu3 %v316_v35 }
  0x2e   :  { %559 = vmatpush.msra.mxu0 %v544_v63 }
  0x2f   :  { %410 = vmatpush.msrb.mxu1 %v321_v32  ;;  %367 = vmatpush.msra.mxu3 %v314_v37 }
  0x31   :  { %411 = vmatpush.msrb.mxu1 %v319_v34  ;;  %368 = vmatpush.msra.mxu3 %v312_v39 }
  0x33   :  { %412 = vmatpush.msrb.mxu1 %v317_v36  ;;  %369 = vmatpush.msra.mxu3 %v310_v42 }
  0x35   :  { %413 = vmatpush.msrb.mxu1 %v315_v38  ;;  %370 = vmatpush.msra.mxu3 %v308_v44 }
  0x37   :  { %414 = vmatpush.msrb.mxu1 %v313_v40  ;;  %371 = vmatpush.msra.mxu3 %v306_v47 }
  0x39   :  { %415 = vmatpush.msrb.mxu1 %v311_v43  ;;  %372 = vmatpush.msra.mxu3 %v304_v51 }
  0x3b   :  { %416 = vmatpush.msrb.mxu1 %v309_v45 }
  0x3d   :  { %417 = vmatpush.msrb.mxu1 %v307_v48 }
  0x3f   :  { %418 = vmatpush.msrb.mxu1 %v305_v54 }
  0x97   :  { %v149_v15 = vpop.f32.mrf.mxu0 }
  0x98   :  { %1155 = vmatmul.msk.f32.vlgmr.msra.gmra.mxu1 %vm171_vm2, %v149_v15  ;;  %1157 = vmatmul.msk.f32.vlgmr.msra.gmra.mxu2 %vm171_vm2, %v149_v15 }
  0x99   :  { %1176 = vmatpush.msk.msra.mxu1 %vm128_vm0, %v1479_v0 }
  0x9b   :  { %657 = vmatpush.msra.mxu1 %v1481_v1 }
  0x9d   :  { %658 = vmatpush.msra.mxu1 %v1485_v2 }
  0x9f   :  { %v152_v16 = vpop.f32.mrf.mxu0 }
  0xa0   :  { %1156 = vmatmul.msk.f32.gmra.mxu1 %vm171_vm2, %v152_v16  ;;  %1158 = vmatmul.msk.f32.gmra.mxu2 %vm171_vm2, %v152_v16 }
 0x115   :  { %v195_v49 = vpop.f32.mrf.mxu1 }
 0x116   :  { %v1633_v53 = vadd.f32 %v195_v49, %v167_v46 }
 0x118   :  { %v1159_v57 = vmul.f32 -1.442695, %v1633_v53 }
 0x11a   :  { %1213 = vpow2.f32 %v1159_v57 }
 0x11b   :  { %v218_v61 = vpop.f32.mrf.mxu2 }
 0x11c   :  { %v1660_v3 = vadd.f32 %v218_v61, %v168_v58 }
 0x11d   :  { %v198_v4 = vpop.f32.mrf.mxu1 }
 0x11e   :  { %v1160_v5 = vmul.f32 -1.442695, %v1660_v3  ;;  %v1664_v6 = vadd.f32 %v198_v4, %v167_v46  ;;  %v542_v4 = vld [vmem:[%s1904_s7 + $0x68] sm:$0xff] }
 0x120   :  { %v1214_v7 = vpop.eup %1213  ;;  %1215 = vpow2.f32 %v1160_v5  ;;  %v1161_v8 = vmul.f32 -1.442695, %v1664_v6  ;;  %v541_v5 = vld [vmem:[%s1904_s7 + $0x60] sm:$0xff] }
 0x121   :  { %v236_v9 = vadd.f32 1.0, %v1214_v7  ;;  %v539_v7 = vld [vmem:[%s1904_s7 + $0x50] sm:$0xff] }
 0x122   :  { %1217 = vpow2.f32 %v1161_v8  ;;  %v538_v8 = vld [vmem:[%s1904_s7 + $0x48] sm:$0xff] }
 0x123   :  { %1219 = vrcp.f32 %v236_v9  ;;  %v221_v10 = vpop.f32.mrf.mxu2  ;;  %v251_v20 = vand.u32 2147483648, %v236_v9  ;;  %v249_v23 = vand.u32 2147483647, %v236_v9  ;;  %vm245_vm4 = vweird.f32 %v236_v9 }
 0x124   :  { %v1667_v11 = vadd.f32 %v221_v10, %v168_v58  ;;  %v536_v10 = vld [vmem:[%s1904_s7 + $0x38] sm:$0xff] }
 0x125   :  { %v252_v28 = vor.u32 1.1754944e-38, %v251_v20  ;;  %vm250_vm6 = vcmp.eq.f32.partialorder %v249_v23, 8.507059e+37  ;;  %v548_v23 = vld [vmem:[%s1904_s7 + $0x98] sm:$0xff] }
 0x126   :  { %v1216_v12 = vpop.eup %1215  ;;  %v1162_v13 = vmul.f32 -1.442695, %v1667_v11  ;;  %594 = vmatpush.msra.mxu2 %v548_v23 }
 0x127   :  { %v237_v14 = vadd.f32 1.0, %v1216_v12  ;;  %v534_v12 = vld [vmem:[%s1904_s7 + $0x28] sm:$0xff] }
 0x128   :  { %v1218_v15 = vpop.eup %1217  ;;  %1221 = vpow2.f32 %v1162_v13  ;;  %v533_v13 = vld [vmem:[%s1904_s7 + $0x20] sm:$0xff] }
 0x129   :  { %v1220_v16 = vpop.eup %1219  ;;  %1223 = vrcp.f32 %v237_v14  ;;  %v238_v17 = vadd.f32 1.0, %v1218_v15  ;;  %v266_v32 = vand.u32 2147483648, %v237_v14  ;;  %v264_v36 = vand.u32 2147483647, %v237_v14 }
 0x12a   :  { %v241_v18 = vmul.f32 %v1220_v16, %v236_v9  ;;  %vm246_vm3 = vweird.f32 %v1220_v16  ;;  %vm260_vm8 = vweird.f32 %v237_v14  ;;  %v537_v9 = vld [vmem:[%s1904_s7 + $0x40] sm:$0xff] }
 0x12b   :  { %1225 = vrcp.f32 %v238_v17  ;;  %vm247_vm5 = vmor %vm245_vm4, %vm246_vm3  ;;  %v281_v40 = vand.u32 2147483648, %v238_v17  ;;  %v267_v42 = vor.u32 1.1754944e-38, %v266_v32  ;;  %v279_v44 = vand.u32 2147483647, %v238_v17 }
 0x12c   :  { %v242_v19 = vsub.f32 1.0, %v241_v18  ;;  %vm265_vm11 = vcmp.eq.f32.partialorder %v264_v36, 8.507059e+37  ;;  %vm275_vm13 = vweird.f32 %v238_v17 }
 0x12d   :  { %v282_v51 = vor.u32 1.1754944e-38, %v281_v40  ;;  %vm280_vm15 = vcmp.eq.f32.partialorder %v279_v44, 8.507059e+37 }
 0x12e   :  { %v1222_v21 = vpop.eup %1221  ;;  %v243_v22 = vmul.f32 %v1220_v16, %v242_v19 }
 0x12f   :  { %v1224_v24 = vpop.eup %1223  ;;  %v239_v25 = vadd.f32 1.0, %v1222_v21 }
 0x130   :  { %v256_v26 = vmul.f32 %v1224_v24, %v237_v14  ;;  %v244_v27 = vadd.f32 %v1220_v16, %v243_v22  ;;  %vm261_vm7 = vweird.f32 %v1224_v24  ;;  %v344_v14 = vld [vmem:[%s1903_s6] sm:$0x3] }
 0x131   :  { %1227 = vrcp.f32 %v239_v25  ;;  %v1226_v29 = vpop.eup %1225  ;;  %vm262_vm9 = vmor %vm260_vm8, %vm261_vm7  ;;  %v296_v52 = vand.u32 2147483648, %v239_v25  ;;  %v294_v55 = vand.u32 2147483647, %v239_v25  ;;  %vm290_vm4 = vweird.f32 %v239_v25 }
 0x132   :  { %v257_v30 = vsub.f32 1.0, %v256_v26  ;;  %v248_v31 = vsel %vm247_vm5, %v1220_v16, %v244_v27  ;;  %v271_v34 = vmul.f32 %v1226_v29, %v238_v17  ;;  %vm276_vm10 = vweird.f32 %v1226_v29  ;;  %v532_v16 = vld [vmem:[%s1904_s7 + $0x18] sm:$0xff]  ;;  %v531_v17 = vld [vmem:[%s1904_s7 + $0x10] sm:$0xff]  ;;  %v529_v27 = vld [vmem:[%s1904_s7] sm:$0xff] }
 0x133   :  { %v253_v33 = vsel %vm250_vm6, %v252_v28, %v248_v31  ;;  %vm277_vm14 = vmor %vm275_vm13, %vm276_vm10  ;;  %v297_v59 = vor.u32 1.1754944e-38, %v296_v52  ;;  %vm295_vm6 = vcmp.eq.f32.partialorder %v294_v55, 8.507059e+37  ;;  %v346_v15 = vperm.slane %v344_v14, 0  ;;  %v547_v26 = vld [vmem:[%s1904_s7 + $0x90] sm:$0xff] }
 0x134   :  { %v258_v35 = vmul.f32 %v1224_v24, %v257_v30  ;;  %v300_v37 = vmul.f32 %v253_v33, %v1633_v53  ;;  %v272_v38 = vsub.f32 1.0, %v271_v34  ;;  %v347_v20 = vperm.slane %v344_v14, 1  ;;  %595 = vmatpush.msra.mxu2 %v547_v26  ;;  %v546_v30 = vld [vmem:[%s1904_s7 + $0x88] sm:$0xff]  ;;  %v545_v33 = vld [vmem:[%s1904_s7 + $0x80] sm:$0xff] }
 0x136   :  { %v259_v39 = vadd.f32 %v1224_v24, %v258_v35  ;;  %373 = vmatmul.f32.vlgmr.msra.gmra.mxu3 %v300_v37  ;;  %419 = vmatmul.f32.vlgmr.msrb.gmra.mxu1 %v300_v37  ;;  %v273_v43 = vmul.f32 %v1226_v29, %v272_v38 }
 0x137   :  { %v1228_v41 = vpop.eup %1227  ;;  %596 = vmatpush.msra.mxu2 %v546_v30 }
 0x138   :  { %v263_v45 = vsel %vm262_vm9, %v1224_v24, %v259_v39  ;;  %v286_v46 = vmul.f32 %v1228_v41, %v239_v25  ;;  %v274_v48 = vadd.f32 %v1226_v29, %v273_v43  ;;  %vm291_vm3 = vweird.f32 %v1228_v41  ;;  %v530_v24 = vld [vmem:[%s1904_s7 + $0x8] sm:$0xff] }
 0x139   :  { %v268_v47 = vsel %vm265_vm11, %v267_v42, %v263_v45  ;;  %vm292_vm5 = vmor %vm290_vm4, %vm291_vm3  ;;  %597 = vmatpush.msra.mxu2 %v545_v33 }
 0x13a   :  { %v301_v49 = vmul.f32 %v268_v47, %v1660_v3  ;;  %v287_v50 = vsub.f32 1.0, %v286_v46  ;;  %v278_v53 = vsel %vm277_vm14, %v1226_v29, %v274_v48  ;;  %v543_v3 = vld [vmem:[%s1904_s7 + $0x70] sm:$0xff]  ;;  %v1756_v46 = vld [vmem:[#allocation4 + $0x10] sm:$0xf] }
 0x13b   :  { %v283_v56 = vsel %vm280_vm15, %v282_v51, %v278_v53  ;;  %560 = vmatpush.msra.mxu0 %v543_v3  ;;  %1173 = vmatpush.msk.msrb.mxu3 %vm128_vm0, %v1756_v46 }
 0x13c   :  { %v288_v54 = vmul.f32 %v1228_v41, %v287_v50  ;;  %1163 = vmatmul.msk.f32.vlgmr.msrb.gmra.mxu0 %vm350_vm12, %v301_v49  ;;  %1165 = vmatmul.msk.f32.vlgmr.msrb.gmra.mxu2 %vm350_vm12, %v301_v49  ;;  %v302_v57 = vmul.f32 %v283_v56, %v1664_v6  ;;  %v540_v6 = vld [vmem:[%s1904_s7 + $0x58] sm:$0xff] }
 0x13d   :  { %561 = vmatpush.msra.mxu0 %v542_v4  ;;  %1200 = vmatpush.msk.msrb.mxu2 %vm128_vm0, %v1479_v0 }
 0x13e   :  { %v289_v58 = vadd.f32 %v1228_v41, %v288_v54  ;;  %376 = vmatmul.f32.gmra.mxu3 %v302_v57  ;;  %422 = vmatmul.f32.gmra.mxu1 %v302_v57 }
 0x13f   :  { %562 = vmatpush.msra.mxu0 %v541_v5  ;;  %1201 = vmatpush.msrb.mxu2 %v1481_v1 }
 0x140   :  { %v293_v60 = vsel %vm292_vm5, %v1228_v41, %v289_v58 }
 0x141   :  { %v298_v61 = vsel %vm295_vm6, %v297_v59, %v293_v60  ;;  %563 = vmatpush.msra.mxu0 %v540_v6  ;;  %1202 = vmatpush.msrb.mxu2 %v1485_v2 }
 0x142   :  { %v303_v62 = vmul.f32 %v298_v61, %v1667_v11  ;;  %v535_v11 = vld [vmem:[%s1904_s7 + $0x30] sm:$0xff] }
 0x143   :  { %564 = vmatpush.msra.mxu0 %v539_v7 }
 0x144   :  { %1164 = vmatmul.msk.f32.gmra.mxu0 %vm350_vm12, %v303_v62  ;;  %1166 = vmatmul.msk.f32.gmra.mxu2 %vm350_vm12, %v303_v62 }
 0x145   :  { %565 = vmatpush.msra.mxu0 %v538_v8 }
 0x147   :  { %566 = vmatpush.msra.mxu0 %v537_v9 }
 0x149   :  { %567 = vmatpush.msra.mxu0 %v536_v10 }
 0x14b   :  { %568 = vmatpush.msra.mxu0 %v535_v11 }
 0x14d   :  { %569 = vmatpush.msra.mxu0 %v534_v12 }
 0x14f   :  { %570 = vmatpush.msra.mxu0 %v533_v13 }
 0x151   :  { %571 = vmatpush.msra.mxu0 %v532_v16 }
 0x153   :  { %572 = vmatpush.msra.mxu0 %v531_v17 }
 0x155   :  { %573 = vmatpush.msra.mxu0 %v530_v24 }
 0x157   :  { %574 = vmatpush.msra.mxu0 %v529_v27 }
 0x1b3   :  { %v420_v18 = vpop.f32.mrf.mxu1 }
 0x1b4   :  { %v421_v28 = vadd.f32 %v420_v18, %v347_v20 }
 0x1b9   :  { %v374_v19 = vpop.f32.mrf.mxu3  ;;  %v397_v22 = vpop.f32.mrf.mxu0 }
 0x1ba   :  { %v375_v21 = vadd.f32 %v374_v19, %v346_v15 }
 0x1bb   :  { %v423_v36 = vpop.f32.mrf.mxu1 }
 0x1bc   :  { %v1729_v25 = vadd.f32 %v397_v22, %v375_v21  ;;  %v424_v41 = vadd.f32 %v423_v36, %v347_v20 }
 0x1be   :  { %v1167_v29 = vmul.f32 -1.442695, %v1729_v25 }
 0x1bf   :  { %v443_v31 = vpop.f32.mrf.mxu2 }
 0x1c0   :  { %1229 = vpow2.f32 %v1167_v29  ;;  %v1741_v32 = vadd.f32 %v443_v31, %v421_v28 }
 0x1c1   :  { %v377_v35 = vpop.f32.mrf.mxu3  ;;  %v400_v38 = vpop.f32.mrf.mxu0 }
 0x1c2   :  { %v1168_v34 = vmul.f32 -1.442695, %v1741_v32  ;;  %v378_v37 = vadd.f32 %v377_v35, %v346_v15  ;;  %v1770_v35 = vld [vmem:[#allocation4] sm:$0xff] }
 0x1c4   :  { %1231 = vpow2.f32 %v1168_v34  ;;  %v1750_v39 = vadd.f32 %v400_v38, %v378_v37  ;;  %v1767_v34 = vld [vmem:[#allocation4 + $0x8] sm:$0xff] }
 0x1c5   :  { %628 = vmatpush.msrb.mxu3 %v1767_v34  ;;  %v1211_v37 = vld [vmem:[%s1905_s8] ss:$0 sm:$0xff] }
 0x1c6   :  { %v1230_v40 = vpop.eup %1229  ;;  %v1169_v43 = vmul.f32 -1.442695, %v1750_v39 }
 0x1c7   :  { %v461_v42 = vadd.f32 1.0, %v1230_v40  ;;  %v446_v44 = vpop.f32.mrf.mxu2  ;;  %629 = vmatpush.msrb.mxu3 %v1770_v35 }
 0x1c8   :  { %v1754_v45 = vadd.f32 %v446_v44, %v424_v41 }
 0x1c9   :  { %1233 = vrcp.f32 %v461_v42  ;;  %v474_v54 = vand.u32 2147483647, %v461_v42  ;;  %v476_v55 = vand.u32 2147483648, %v461_v42  ;;  %vm470_vm8 = vweird.f32 %v461_v42 }
 0x1ca   :  { %v1232_v0 = vpop.eup %1231  ;;  %1235 = vpow2.f32 %v1169_v43  ;;  %v1170_v1 = vmul.f32 -1.442695, %v1754_v45 }
 0x1cb   :  { %v462_v47 = vadd.f32 1.0, %v1232_v0  ;;  %vm475_vm10 = vcmp.eq.f32.partialorder %v474_v54, 8.507059e+37  ;;  %v477_v61 = vor.u32 1.1754944e-38, %v476_v55  ;;  %v675_v0 = vld [vmem:[#allocation6 + $0x48] sm:$0xff] }
 0x1cc   :  { %1237 = vpow2.f32 %v1170_v1  ;;  %v672_v1 = vld [vmem:[#allocation6 + $0x30] sm:$0xff]  ;;  %722 = vmatpush.msra.mxu3 %v675_v0  ;;  %v667_v54 = vld [vmem:[#allocation6 + $0x8] sm:$0xff]  ;;  %v847_v0 = vld [vmem:[#allocation7 + $0x108] sm:$0xff] }
 0x1cd   :  { %1239 = vrcp.f32 %v462_v47  ;;  %v491_v62 = vand.u32 2147483648, %v462_v47  ;;  %v489_v4 = vand.u32 2147483647, %v462_v47  ;;  %vm485_vm13 = vweird.f32 %v462_v47 }
 0x1cf   :  { %v1234_v2 = vpop.eup %1233  ;;  %v492_v11 = vor.u32 1.1754944e-38, %v491_v62  ;;  %vm490_vm15 = vcmp.eq.f32.partialorder %v489_v4, 8.507059e+37  ;;  %v841_v62 = vld [vmem:[#allocation7 + $0xd8] sm:$0xff]  ;;  %v836_v4 = vld [vmem:[#allocation7 + $0xb0] sm:$0xff] }
 0x1d0   :  { %v1236_v48 = vpop.eup %1235  ;;  %v466_v49 = vmul.f32 %v1234_v2, %v461_v42  ;;  %vm471_vm7 = vweird.f32 %v1234_v2 }
 0x1d1   :  { %v463_v50 = vadd.f32 1.0, %v1236_v48  ;;  %vm472_vm9 = vmor %vm470_vm8, %vm471_vm7  ;;  %v671_v48 = vld [vmem:[#allocation6 + $0x28] sm:$0xff] }
 0x1d2   :  { %v1238_v51 = vpop.eup %1237  ;;  %v467_v52 = vsub.f32 1.0, %v466_v49  ;;  %v668_v49 = vld [vmem:[#allocation6 + $0x10] sm:$0xff] }
 0x1d3   :  { %v1240_v53 = vpop.eup %1239  ;;  %1241 = vrcp.f32 %v463_v50  ;;  %v464_v56 = vadd.f32 1.0, %v1238_v51  ;;  %v504_v16 = vand.u32 2147483647, %v463_v50  ;;  %v506_v17 = vand.u32 2147483648, %v463_v50 }
 0x1d4   :  { %v468_v57 = vmul.f32 %v1234_v2, %v467_v52  ;;  %v481_v58 = vmul.f32 %v1240_v53, %v462_v47  ;;  %vm486_vm11 = vweird.f32 %v1240_v53  ;;  %vm500_vm4 = vweird.f32 %v463_v50  ;;  %v673_v47 = vld [vmem:[#allocation6 + $0x38] sm:$0xff] }
 0x1d5   :  { %1243 = vrcp.f32 %v464_v56  ;;  %vm487_vm14 = vmor %vm485_vm13, %vm486_vm11  ;;  %v521_v21 = vand.u32 2147483648, %v464_v56  ;;  %v519_v23 = vand.u32 2147483647, %v464_v56  ;;  %vm515_vm7 = vweird.f32 %v464_v56  ;;  %723 = vmatpush.msra.mxu3 %v673_v47 }
 0x1d6   :  { %v469_v59 = vadd.f32 %v1234_v2, %v468_v57  ;;  %v482_v60 = vsub.f32 1.0, %v481_v58  ;;  %vm505_vm8 = vcmp.eq.f32.partialorder %v504_v16, 8.507059e+37  ;;  %v844_v57 = vld [vmem:[#allocation7 + $0xf0] sm:$0xff]  ;;  %v845_v58 = vld [vmem:[#allocation7 + $0xf8] sm:$0xff] }
 0x1d7   :  { %v522_v28 = vor.u32 1.1754944e-38, %v521_v21  ;;  %724 = vmatpush.msra.mxu3 %v671_v48  ;;  %866 = vmatpush.msrb.mxu0 %v844_v57  ;;  %v824_v16 = vld [vmem:[#allocation7 + $0x50] sm:$0xff]  ;;  %v853_v21 = vld [vmem:[#allocation7 + $0x138] sm:$0xff] }
 0x1d8   :  { %v473_v63 = vsel %vm472_vm9, %v1234_v2, %v469_v59  ;;  %v483_v3 = vmul.f32 %v1240_v53, %v482_v60  ;;  %v670_v2 = vld [vmem:[#allocation6 + $0x20] sm:$0xff]  ;;  %v842_v59 = vld [vmem:[#allocation7 + $0xe0] sm:$0xff]  ;;  %v843_v60 = vld [vmem:[#allocation7 + $0xe8] sm:$0xff] }
 0x1d9   :  { %v1242_v5 = vpop.eup %1241  ;;  %v478_v6 = vsel %vm475_vm10, %v477_v61, %v473_v63  ;;  %vm520_vm10 = vcmp.eq.f32.partialorder %v519_v23, 8.507059e+37  ;;  %867 = vmatpush.msrb.mxu0 %v842_v59  ;;  %v840_v61 = vld [vmem:[#allocation7 + $0xd0] sm:$0xff]  ;;  %v838_v63 = vld [vmem:[#allocation7 + $0xc0] sm:$0xff] }
 0x1da   :  { %v525_v7 = vmul.f32 %v478_v6, %v1729_v25  ;;  %v484_v8 = vadd.f32 %v1240_v53, %v483_v3  ;;  %v496_v9 = vmul.f32 %v1242_v5, %v463_v50  ;;  %vm501_vm3 = vweird.f32 %v1242_v5  ;;  %v669_v50 = vld [vmem:[#allocation6 + $0x18] sm:$0xff]  ;;  %v834_v6 = vld [vmem:[#allocation7 + $0xa0] sm:$0xff]  ;;  %v852_v23 = vld [vmem:[#allocation7 + $0x130] sm:$0xff] }
 0x1db   :  { %v1244_v10 = vpop.eup %1243  ;;  %vm502_vm6 = vmor %vm500_vm4, %vm501_vm3  ;;  %v507_v25 = vor.u32 1.1754944e-38, %v506_v17  ;;  %725 = vmatpush.msra.mxu3 %v669_v50  ;;  %868 = vmatpush.msrb.mxu0 %v840_v61  ;;  %v839_v3 = vld [vmem:[#allocation7 + $0xc8] sm:$0xff]  ;;  %v825_v17 = vld [vmem:[#allocation7 + $0x58] sm:$0xff] }
 0x1dc   :  { %v488_v12 = vsel %vm487_vm14, %v1240_v53, %v484_v8  ;;  %v511_v13 = vmul.f32 %v1244_v10, %v464_v56  ;;  %575 = vmatmul.f32.vlgmr.msra.gmra.mxu0 %v525_v7  ;;  %v497_v14 = vsub.f32 1.0, %v496_v9  ;;  %vm516_vm5 = vweird.f32 %v1244_v10  ;;  %v666_v53 = vld [vmem:[#allocation6] sm:$0xff]  ;;  %v835_v7 = vld [vmem:[#allocation7 + $0xa8] sm:$0xff]  ;;  %v833_v9 = vld [vmem:[#allocation7 + $0x98] sm:$0xff]  ;;  %901 = vmatpush.msrb.mxu1 %v852_v23 }
 0x1dd   :  { %v493_v15 = vsel %vm490_vm15, %v492_v11, %v488_v12  ;;  %vm517_vm9 = vmor %vm515_vm7, %vm516_vm5  ;;  %726 = vmatpush.msra.mxu3 %v667_v54  ;;  %869 = vmatpush.msrb.mxu0 %v838_v63  ;;  %v832_v8 = vld [vmem:[#allocation7 + $0x90] sm:$0xff]  ;;  %v831_v11 = vld [vmem:[#allocation7 + $0x88] sm:$0xff] }
 0x1de   :  { %v526_v18 = vmul.f32 %v493_v15, %v1741_v32  ;;  %v512_v19 = vsub.f32 1.0, %v511_v13  ;;  %v498_v20 = vmul.f32 %v1242_v5, %v497_v14  ;;  %v828_v12 = vld [vmem:[#allocation7 + $0x70] sm:$0xff]  ;;  %v829_v13 = vld [vmem:[#allocation7 + $0x78] sm:$0xff]  ;;  %v826_v14 = vld [vmem:[#allocation7 + $0x60] sm:$0xff] }
 0x1df   :  { %870 = vmatpush.msrb.mxu0 %v836_v4  ;;  %v827_v15 = vld [vmem:[#allocation7 + $0x68] sm:$0xff] }
 0x1e0   :  { %v513_v22 = vmul.f32 %v1244_v10, %v512_v19  ;;  %1171 = vmatmul.msk.f32.vlgmr.msra.gmra.mxu2 %vm350_vm12, %v526_v18  ;;  %v499_v24 = vadd.f32 %v1242_v5, %v498_v20  ;;  %v676_v18 = vld [vmem:[%s1907_s10] sm:$0x3]  ;;  %v823_v20 = vld [vmem:[#allocation7 + $0x48] sm:$0xff] }
 0x1e1   :  { %871 = vmatpush.msrb.mxu0 %v834_v6  ;;  %v822_v19 = vld [vmem:[#allocation7 + $0x40] sm:$0xff] }
 0x1e2   :  { %v514_v26 = vadd.f32 %v1244_v10, %v513_v22  ;;  %v503_v27 = vsel %vm502_vm6, %v1242_v5, %v499_v24  ;;  %v837_v5 = vld [vmem:[#allocation7 + $0xb8] sm:$0xff]  ;;  %v820_v22 = vld [vmem:[#allocation7 + $0x30] sm:$0xff]  ;;  %v678_v24 = vperm.slane %v676_v18, 0 }
 0x1e3   :  { %v508_v29 = vsel %vm505_vm8, %v507_v25, %v503_v27  ;;  %872 = vmatpush.msrb.mxu0 %v832_v8  ;;  %v679_v25 = vperm.slane %v676_v18, 1  ;;  %v818_v27 = vld [vmem:[#allocation7 + $0x20] sm:$0xff] }
 0x1e4   :  { %v518_v30 = vsel %vm517_vm9, %v1244_v10, %v514_v26  ;;  %v527_v31 = vmul.f32 %v508_v29, %v1750_v39  ;;  %v830_v10 = vld [vmem:[#allocation7 + $0x80] sm:$0xff]  ;;  %v821_v26 = vld [vmem:[#allocation7 + $0x38] sm:$0xff]  ;;  %v819_v29 = vld [vmem:[#allocation7 + $0x28] sm:$0xff] }
 0x1e5   :  { %v523_v32 = vsel %vm520_vm10, %v522_v28, %v518_v30  ;;  %873 = vmatpush.msrb.mxu0 %v830_v10  ;;  %v850_v28 = vld [vmem:[#allocation7 + $0x120] sm:$0xff]  ;;  %v851_v30 = vld [vmem:[#allocation7 + $0x128] sm:$0xff] }
 0x1e6   :  { %v528_v33 = vmul.f32 %v523_v32, %v1754_v45  ;;  %578 = vmatmul.f32.gmra.mxu0 %v527_v31  ;;  %v674_v45 = vld [vmem:[#allocation6 + $0x40] sm:$0xff]  ;;  %902 = vmatpush.msrb.mxu1 %v850_v28 }
 0x1e7   :  { %699 = vmatpush.msra.mxu2 %v674_v45  ;;  %874 = vmatpush.msrb.mxu0 %v828_v12 }
 0x1e8   :  { %1172 = vmatmul.msk.f32.gmra.mxu2 %vm350_vm12, %v528_v33  ;;  %v816_v33 = vld [vmem:[#allocation7 + $0x10] sm:$0xff] }
 0x1e9   :  { %700 = vmatpush.msra.mxu2 %v672_v1  ;;  %875 = vmatpush.msrb.mxu0 %v826_v14 }
 0x1eb   :  { %701 = vmatpush.msra.mxu2 %v670_v2  ;;  %876 = vmatpush.msrb.mxu0 %v824_v16 }
 0x1ed   :  { %702 = vmatpush.msra.mxu2 %v668_v49  ;;  %877 = vmatpush.msrb.mxu0 %v822_v19 }
 0x1ef   :  { %703 = vmatpush.msra.mxu2 %v666_v53  ;;  %878 = vmatpush.msrb.mxu0 %v820_v22 }
 0x1f1   :  { %879 = vmatpush.msrb.mxu0 %v818_v27 }
 0x1f3   :  { %880 = vmatpush.msrb.mxu0 %v816_v33 }
 0x259   :  { %v576_v36 = vpop.f32.mrf.mxu0 }
 0x25a   :  { %v577_v38 = vadd.f32 %v1211_v37, %v576_v36  ;;  %v848_v36 = vld [vmem:[#allocation7 + $0x110] sm:$0xff] }
 0x25b   :  { %903 = vmatpush.msrb.mxu1 %v848_v36 }
 0x263   :  { %v599_v39 = vpop.f32.mrf.mxu2  ;;  %v579_v41 = vpop.f32.mrf.mxu0 }
 0x264   :  { %v600_v40 = vadd.f32 %v599_v39, %v577_v38  ;;  %v580_v42 = vadd.f32 %v1211_v37, %v579_v41  ;;  %v817_v37 = vld [vmem:[#allocation7 + $0x18] sm:$0xff]  ;;  %v814_v41 = vld [vmem:[#allocation7] sm:$0xff] }
 0x265   :  { %881 = vmatpush.msrb.mxu0 %v814_v41  ;;  %v1053_v41 = vld [vmem:[%s1910_s13 + $0x78] sm:$0xff] }
 0x266   :  { %1174 = vmatmul.msk.f32.vlgmr.msrb.gmra.mxu3 %vm121_vm1, %v600_v40  ;;  %v849_v40 = vld [vmem:[#allocation7 + $0x118] sm:$0xff] }
 0x267   :  { %947 = vmatpush.msrb.mxu3 %v853_v21  ;;  %1197 = vmatpush.msk.msra.mxu0 %vm128_vm0, %v1756_v46 }
 0x269   :  { %948 = vmatpush.msrb.mxu3 %v851_v30  ;;  %1134 = vmatpush.msra.mxu0 %v1767_v34 }
 0x26b   :  { %v602_v43 = vpop.f32.mrf.mxu2  ;;  %949 = vmatpush.msrb.mxu3 %v849_v40  ;;  %1135 = vmatpush.msra.mxu0 %v1770_v35 }
 0x26c   :  { %v603_v44 = vadd.f32 %v602_v43, %v580_v42  ;;  %v846_v42 = vld [vmem:[#allocation7 + $0x100] sm:$0xff]  ;;  %v815_v43 = vld [vmem:[#allocation7 + $0x8] sm:$0xff] }
 0x26d   :  { %904 = vmatpush.msrb.mxu1 %v846_v42  ;;  %950 = vmatpush.msrb.mxu3 %v847_v0  ;;  %v1052_v42 = vld [vmem:[%s1910_s13 + $0x70] sm:$0xff] }
 0x26e   :  { %1175 = vmatmul.msk.f32.gmra.mxu3 %vm121_vm1, %v603_v44  ;;  %v1048_v0 = vld [vmem:[%s1910_s13 + $0x50] sm:$0xff] }
 0x2e9   :  { %v631_v51 = vpop.f32.mrf.mxu3 }
 0x2ea   :  { %1177 = vmatmul.msk.f32.vlgmr.msra.gmra.mxu1 %vm121_vm1, %v631_v51 }
 0x2eb   :  { %1068 = vmatpush.msra.mxu1 %v1053_v41 }
 0x2ed   :  { %1069 = vmatpush.msra.mxu1 %v1052_v42 }
 0x2f1   :  { %v634_v52 = vpop.f32.mrf.mxu3 }
 0x2f2   :  { %1178 = vmatmul.msk.f32.vlgmr.msrb.gmra.mxu2 %vm121_vm1, %v634_v52 }
 0x2f3   :  { %912 = vmatpush.msrb.mxu2 %v845_v58 }
 0x2f5   :  { %913 = vmatpush.msrb.mxu2 %v843_v60 }
 0x2f7   :  { %914 = vmatpush.msrb.mxu2 %v841_v62 }
 0x2f9   :  { %915 = vmatpush.msrb.mxu2 %v839_v3 }
 0x2fb   :  { %916 = vmatpush.msrb.mxu2 %v837_v5 }
 0x2fd   :  { %917 = vmatpush.msrb.mxu2 %v835_v7 }
 0x2ff   :  { %918 = vmatpush.msrb.mxu2 %v833_v9 }
 0x301   :  { %919 = vmatpush.msrb.mxu2 %v831_v11 }
 0x303   :  { %920 = vmatpush.msrb.mxu2 %v829_v13 }
 0x305   :  { %921 = vmatpush.msrb.mxu2 %v827_v15 }
 0x307   :  { %922 = vmatpush.msrb.mxu2 %v825_v17 }
 0x309   :  { %923 = vmatpush.msrb.mxu2 %v823_v20 }
 0x30b   :  { %924 = vmatpush.msrb.mxu2 %v821_v26 }
 0x30d   :  { %925 = vmatpush.msrb.mxu2 %v819_v29 }
 0x30f   :  { %926 = vmatpush.msrb.mxu2 %v817_v37 }
 0x311   :  { %927 = vmatpush.msrb.mxu2 %v815_v43  ;;  %v1051_v43 = vld [vmem:[%s1910_s13 + $0x68] sm:$0xff] }
 0x312   :  { %1070 = vmatpush.msra.mxu1 %v1051_v43 }
 0x367   :  { %v660_v55 = vpop.f32.mrf.mxu1 }
 0x368   :  { %1179 = vmatmul.msk.f32.vlgmr.msra.gmra.mxu2 %vm171_vm2, %v660_v55  ;;  %1181 = vmatmul.msk.f32.vlgmr.msra.gmra.mxu3 %vm171_vm2, %v660_v55 }
 0x375   :  { %v663_v56 = vpop.f32.mrf.mxu2 }
 0x376   :  { %1180 = vmatmul.msk.f32.gmra.mxu2 %vm171_vm2, %v663_v56  ;;  %1182 = vmatmul.msk.f32.gmra.mxu3 %vm171_vm2, %v663_v56 }
 0x3eb   :  { %v705_v31 = vpop.f32.mrf.mxu2  ;;  %v728_v32 = vpop.f32.mrf.mxu3 }
 0x3ec   :  { %v1787_v38 = vadd.f32 %v705_v31, %v678_v24  ;;  %v1789_v39 = vadd.f32 %v728_v32, %v679_v25 }
 0x3ee   :  { %v1183_v44 = vmul.f32 -1.442695, %v1787_v38  ;;  %v1184_v45 = vmul.f32 -1.442695, %v1789_v39 }
 0x3f0   :  { %1245 = vpow2.f32 %v1183_v44  ;;  %v1050_v44 = vld [vmem:[%s1910_s13 + $0x60] sm:$0xff] }
 0x3f1   :  { %1247 = vpow2.f32 %v1184_v45  ;;  %1071 = vmatpush.msra.mxu1 %v1050_v44  ;;  %v1049_v45 = vld [vmem:[%s1910_s13 + $0x58] sm:$0xff] }
 0x3f3   :  { %1072 = vmatpush.msra.mxu1 %v1049_v45 }
 0x3f5   :  { %1073 = vmatpush.msra.mxu1 %v1048_v0 }
 0x3f6   :  { %v1246_v1 = vpop.eup %1245 }
 0x3f7   :  { %v1248_v47 = vpop.eup %1247  ;;  %v746_v2 = vadd.f32 1.0, %v1246_v1  ;;  %v1047_v1 = vld [vmem:[%s1910_s13 + $0x48] sm:$0xff] }
 0x3f8   :  { %v747_v48 = vadd.f32 1.0, %v1248_v47  ;;  %1074 = vmatpush.msra.mxu1 %v1047_v1  ;;  %v1046_v47 = vld [vmem:[%s1910_s13 + $0x40] sm:$0xff] }
 0x3f9   :  { %1249 = vrcp.f32 %v746_v2  ;;  %v708_v49 = vpop.f32.mrf.mxu2  ;;  %v731_v50 = vpop.f32.mrf.mxu3  ;;  %v761_v57 = vand.u32 2147483648, %v746_v2  ;;  %v759_v60 = vand.u32 2147483647, %v746_v2  ;;  %vm755_vm11 = vweird.f32 %v746_v2 }
 0x3fa   :  { %1251 = vrcp.f32 %v747_v48  ;;  %v1797_v51 = vadd.f32 %v708_v49, %v678_v24  ;;  %v1799_v52 = vadd.f32 %v731_v50, %v679_v25  ;;  %v776_v61 = vand.u32 2147483648, %v747_v48  ;;  %1075 = vmatpush.msra.mxu1 %v1046_v47  ;;  %v854_v49 = vld [vmem:[%s1909_s12] sm:$0x3]  ;;  %v1043_v50 = vld [vmem:[%s1910_s13 + $0x28] sm:$0xff] }
 0x3fb   :  { %v774_v3 = vand.u32 2147483647, %v747_v48  ;;  %v762_v7 = vor.u32 1.1754944e-38, %v761_v57  ;;  %vm770_vm14 = vweird.f32 %v747_v48  ;;  %vm760_vm15 = vcmp.eq.f32.partialorder %v759_v60, 8.507059e+37  ;;  %v1039_v57 = vld [vmem:[%s1910_s13 + $0x8] sm:$0xff]  ;;  %v1038_v60 = vld [vmem:[%s1910_s13] sm:$0xff] }
 0x3fc   :  { %v1185_v53 = vmul.f32 -1.442695, %v1797_v51  ;;  %v1186_v46 = vmul.f32 -1.442695, %v1799_v52  ;;  %v777_v11 = vor.u32 1.1754944e-38, %v776_v61 }
 0x3fd   :  { %vm775_vm4 = vcmp.eq.f32.partialorder %v774_v3, 8.507059e+37 }
 0x3fe   :  { %1253 = vpow2.f32 %v1185_v53  ;;  %v1041_v53 = vld [vmem:[%s1910_s13 + $0x18] sm:$0xff] }
 0x3ff   :  { %v1250_v54 = vpop.eup %1249  ;;  %1255 = vpow2.f32 %v1186_v46 }
 0x400   :  { %v1252_v34 = vpop.eup %1251  ;;  %v751_v35 = vmul.f32 %v1250_v54, %v746_v2  ;;  %vm756_vm0 = vweird.f32 %v1250_v54  ;;  %v1045_v2 = vld [vmem:[%s1910_s13 + $0x38] sm:$0xff] }
 0x401   :  { %v766_v55 = vmul.f32 %v1252_v34, %v747_v48  ;;  %vm771_vm2 = vweird.f32 %v1252_v34  ;;  %vm757_vm13 = vmor %vm755_vm11, %vm756_vm0  ;;  %1076 = vmatpush.msra.mxu1 %v1045_v2  ;;  %v1044_v48 = vld [vmem:[%s1910_s13 + $0x30] sm:$0xff] }
 0x402   :  { %v752_v56 = vsub.f32 1.0, %v751_v35  ;;  %vm772_vm3 = vmor %vm770_vm14, %vm771_vm2 }
 0x403   :  { %v767_v58 = vsub.f32 1.0, %v766_v55  ;;  %1077 = vmatpush.msra.mxu1 %v1044_v48 }
 0x404   :  { %v753_v59 = vmul.f32 %v1250_v54, %v752_v56  ;;  %v1254_v62 = vpop.eup %1253  ;;  %v857_v56 = vperm.slane %v854_v49, 1 }
 0x405   :  { %v768_v63 = vmul.f32 %v1252_v34, %v767_v58  ;;  %v1256_v4 = vpop.eup %1255  ;;  %v748_v6 = vadd.f32 1.0, %v1254_v62  ;;  %1078 = vmatpush.msra.mxu1 %v1043_v50 }
 0x406   :  { %v754_v5 = vadd.f32 %v1250_v54, %v753_v59  ;;  %v749_v9 = vadd.f32 1.0, %v1256_v4  ;;  %v1057_v59 = vld [vmem:[%s1910_s13 + $0x98] sm:$0xff] }
 0x407   :  { %v769_v8 = vadd.f32 %v1252_v34, %v768_v63  ;;  %1257 = vrcp.f32 %v748_v6  ;;  %v791_v23 = vand.u32 2147483648, %v748_v6  ;;  %v789_v26 = vand.u32 2147483647, %v748_v6  ;;  %1103 = vmatpush.msra.mxu3 %v1057_v59  ;;  %v1056_v63 = vld [vmem:[%s1910_s13 + $0x90] sm:$0xff] }
 0x408   :  { %v758_v10 = vsel %vm757_vm13, %v1250_v54, %v754_v5  ;;  %1259 = vrcp.f32 %v749_v9  ;;  %v806_v24 = vand.u32 2147483648, %v749_v9  ;;  %v804_v28 = vand.u32 2147483647, %v749_v9  ;;  %v1055_v5 = vld [vmem:[%s1910_s13 + $0x88] sm:$0xff] }
 0x409   :  { %v763_v12 = vsel %vm760_vm15, %v762_v7, %v758_v10  ;;  %v773_v13 = vsel %vm772_vm3, %v1252_v34, %v769_v8  ;;  %vm785_vm7 = vweird.f32 %v748_v6  ;;  %vm800_vm8 = vweird.f32 %v749_v9  ;;  %v1040_v34 = vld [vmem:[%s1910_s13 + $0x10] sm:$0xff]  ;;  %1104 = vmatpush.msra.mxu3 %v1056_v63  ;;  %v1054_v7 = vld [vmem:[%s1910_s13 + $0x80] sm:$0xff] }
 0x40a   :  { %v810_v14 = vmul.f32 %v763_v12, %v1787_v38  ;;  %v778_v15 = vsel %vm775_vm4, %v777_v11, %v773_v13  ;;  %v792_v31 = vor.u32 1.1754944e-38, %v791_v23  ;;  %v807_v32 = vor.u32 1.1754944e-38, %v806_v24 }
 0x40b   :  { %v811_v16 = vmul.f32 %v778_v15, %v1789_v39  ;;  %vm790_vm0 = vcmp.eq.f32.partialorder %v789_v26, 8.507059e+37  ;;  %vm805_vm2 = vcmp.eq.f32.partialorder %v804_v28, 8.507059e+37  ;;  %1105 = vmatpush.msra.mxu3 %v1055_v5 }
 0x40c   :  { %882 = vmatmul.f32.vlgmr.msrb.gmra.mxu0 %v810_v14  ;;  %928 = vmatmul.f32.vlgmr.msrb.gmra.mxu2 %v810_v14 }
 0x40d   :  { %1187 = vmatmul.msk.f32.vlgmr.msrb.gmra.mxu1 %vm350_vm12, %v811_v16  ;;  %1189 = vmatmul.msk.f32.vlgmr.msrb.gmra.mxu3 %vm350_vm12, %v811_v16  ;;  %v1258_v17 = vpop.eup %1257 }
 0x40e   :  { %v1260_v18 = vpop.eup %1259  ;;  %v781_v19 = vmul.f32 %v1258_v17, %v748_v6  ;;  %vm786_vm5 = vweird.f32 %v1258_v17  ;;  %1106 = vmatpush.msra.mxu3 %v1054_v7 }
 0x40f   :  { %v796_v20 = vmul.f32 %v1260_v18, %v749_v9  ;;  %vm801_vm6 = vweird.f32 %v1260_v18  ;;  %vm787_vm9 = vmor %vm785_vm7, %vm786_vm5 }
 0x410   :  { %v782_v21 = vsub.f32 1.0, %v781_v19  ;;  %vm802_vm10 = vmor %vm800_vm8, %vm801_vm6 }
 0x411   :  { %v797_v22 = vsub.f32 1.0, %v796_v20 }
 0x412   :  { %v783_v25 = vmul.f32 %v1258_v17, %v782_v21 }
 0x413   :  { %v798_v27 = vmul.f32 %v1260_v18, %v797_v22 }
 0x414   :  { %v784_v29 = vadd.f32 %v1258_v17, %v783_v25 }
 0x415   :  { %v799_v30 = vadd.f32 %v1260_v18, %v798_v27 }
 0x416   :  { %v788_v33 = vsel %vm787_vm9, %v1258_v17, %v784_v29 }
 0x417   :  { %v803_v36 = vsel %vm802_vm10, %v1260_v18, %v799_v30  ;;  %v793_v37 = vsel %vm790_vm0, %v792_v31, %v788_v33 }
 0x418   :  { %v808_v38 = vsel %vm805_vm2, %v807_v32, %v803_v36  ;;  %v812_v39 = vmul.f32 %v793_v37, %v1797_v51  ;;  %v856_v51 = vperm.slane %v854_v49, 0 }
 0x419   :  { %v813_v40 = vmul.f32 %v808_v38, %v1799_v52  ;;  %v1042_v52 = vld [vmem:[%s1910_s13 + $0x20] sm:$0xff] }
 0x41a   :  { %885 = vmatmul.f32.gmra.mxu0 %v812_v39  ;;  %931 = vmatmul.f32.gmra.mxu2 %v812_v39 }
 0x41b   :  { %1188 = vmatmul.msk.f32.gmra.mxu1 %vm350_vm12, %v813_v40  ;;  %1190 = vmatmul.msk.f32.gmra.mxu3 %vm350_vm12, %v813_v40 }
 0x41c   :  { %1079 = vmatpush.msra.mxu1 %v1042_v52 }
 0x41e   :  { %1080 = vmatpush.msra.mxu1 %v1041_v53 }
 0x420   :  { %1081 = vmatpush.msra.mxu1 %v1040_v34 }
 0x422   :  { %1082 = vmatpush.msra.mxu1 %v1039_v57 }
 0x424   :  { %1083 = vmatpush.msra.mxu1 %v1038_v60 }
 0x489   :  { %v883_v46 = vpop.f32.mrf.mxu0 }
 0x48a   :  { %v884_v54 = vadd.f32 %v883_v46, %v856_v51  ;;  %v906_v35 = vpop.f32.mrf.mxu1 }
 0x48c   :  { %v907_v55 = vadd.f32 %v906_v35, %v884_v54 }
 0x48e   :  { %v1191_v58 = vmul.f32 -1.442695, %v907_v55 }
 0x48f   :  { %v929_v61 = vpop.f32.mrf.mxu2 }
 0x490   :  { %1261 = vpow2.f32 %v1191_v58  ;;  %v930_v62 = vadd.f32 %v929_v61, %v857_v56  ;;  %v952_v3 = vpop.f32.mrf.mxu3 }
 0x492   :  { %v953_v4 = vadd.f32 %v952_v3, %v930_v62 }
 0x494   :  { %v1192_v6 = vmul.f32 -1.442695, %v953_v4 }
 0x496   :  { %v1262_v8 = vpop.eup %1261  ;;  %1263 = vpow2.f32 %v1192_v6  ;;  %v1212_v6 = vld [vmem:[%s1911_s14] ss:$0 sm:$0xff] }
 0x497   :  { %v970_v9 = vadd.f32 1.0, %v1262_v8  ;;  %v886_v10 = vpop.f32.mrf.mxu0 }
 0x498   :  { %v887_v11 = vadd.f32 %v886_v10, %v856_v51  ;;  %v909_v12 = vpop.f32.mrf.mxu1 }
 0x499   :  { %1265 = vrcp.f32 %v970_v9  ;;  %v985_v24 = vand.u32 2147483648, %v970_v9  ;;  %v983_v26 = vand.u32 2147483647, %v970_v9  ;;  %vm979_vm13 = vweird.f32 %v970_v9 }
 0x49a   :  { %v1874_v14 = vadd.f32 %v909_v12, %v887_v11 }
 0x49b   :  { %v986_v32 = vor.u32 1.1754944e-38, %v985_v24  ;;  %vm984_vm15 = vcmp.eq.f32.partialorder %v983_v26, 8.507059e+37 }
 0x49c   :  { %v1264_v13 = vpop.eup %1263  ;;  %v1193_v16 = vmul.f32 -1.442695, %v1874_v14 }
 0x49d   :  { %v971_v15 = vadd.f32 1.0, %v1264_v13  ;;  %v932_v17 = vpop.f32.mrf.mxu2 }
 0x49e   :  { %v933_v20 = vadd.f32 %v932_v17, %v857_v56  ;;  %v955_v21 = vpop.f32.mrf.mxu3 }
 0x49f   :  { %v1266_v18 = vpop.eup %1265  ;;  %1267 = vrcp.f32 %v971_v15  ;;  %v1000_v39 = vand.u32 2147483648, %v971_v15  ;;  %v998_v42 = vand.u32 2147483647, %v971_v15  ;;  %vm994_vm4 = vweird.f32 %v971_v15 }
 0x4a0   :  { %v975_v19 = vmul.f32 %v1266_v18, %v970_v9  ;;  %1269 = vpow2.f32 %v1193_v16  ;;  %v1877_v23 = vadd.f32 %v955_v21, %v933_v20  ;;  %vm980_vm11 = vweird.f32 %v1266_v18 }
 0x4a1   :  { %vm981_vm14 = vmor %vm979_vm13, %vm980_vm11  ;;  %v1001_v45 = vor.u32 1.1754944e-38, %v1000_v39  ;;  %vm999_vm6 = vcmp.eq.f32.partialorder %v998_v42, 8.507059e+37 }
 0x4a2   :  { %v976_v22 = vsub.f32 1.0, %v975_v19  ;;  %v1194_v27 = vmul.f32 -1.442695, %v1877_v23 }
 0x4a4   :  { %v977_v25 = vmul.f32 %v1266_v18, %v976_v22  ;;  %1271 = vpow2.f32 %v1194_v27 }
 0x4a5   :  { %v1268_v28 = vpop.eup %1267 }
 0x4a6   :  { %v1270_v29 = vpop.eup %1269  ;;  %v978_v30 = vadd.f32 %v1266_v18, %v977_v25  ;;  %v990_v31 = vmul.f32 %v1268_v28, %v971_v15  ;;  %vm995_vm3 = vweird.f32 %v1268_v28 }
 0x4a7   :  { %v972_v33 = vadd.f32 1.0, %v1270_v29  ;;  %vm996_vm5 = vmor %vm994_vm4, %vm995_vm3 }
 0x4a8   :  { %v982_v36 = vsel %vm981_vm14, %v1266_v18, %v978_v30  ;;  %v991_v37 = vsub.f32 1.0, %v990_v31 }
 0x4a9   :  { %v987_v38 = vsel %vm984_vm15, %v986_v32, %v982_v36  ;;  %1273 = vrcp.f32 %v972_v33  ;;  %v1015_v51 = vand.u32 2147483648, %v972_v33  ;;  %v1013_v53 = vand.u32 2147483647, %v972_v33 }
 0x4aa   :  { %v1034_v40 = vmul.f32 %v987_v38, %v907_v55  ;;  %v992_v41 = vmul.f32 %v1268_v28, %v991_v37  ;;  %v1272_v43 = vpop.eup %1271  ;;  %vm1009_vm8 = vweird.f32 %v972_v33 }
 0x4ab   :  { %v973_v0 = vadd.f32 1.0, %v1272_v43  ;;  %v1016_v35 = vor.u32 1.1754944e-38, %v1015_v51  ;;  %vm1014_vm10 = vcmp.eq.f32.partialorder %v1013_v53, 8.507059e+37 }
 0x4ac   :  { %v993_v44 = vadd.f32 %v1268_v28, %v992_v41  ;;  %1084 = vmatmul.f32.vlgmr.msra.gmra.mxu1 %v1034_v40 }
 0x4ad   :  { %1275 = vrcp.f32 %v973_v0  ;;  %v1030_v57 = vand.u32 2147483648, %v973_v0  ;;  %v1028_v60 = vand.u32 2147483647, %v973_v0  ;;  %vm1024_vm2 = vweird.f32 %v973_v0 }
 0x4ae   :  { %v997_v1 = vsel %vm996_vm5, %v1268_v28, %v993_v44 }
 0x4af   :  { %v1274_v47 = vpop.eup %1273  ;;  %v1002_v2 = vsel %vm999_vm6, %v1001_v45, %v997_v1  ;;  %v1031_v63 = vor.u32 1.1754944e-38, %v1030_v57  ;;  %vm1029_vm13 = vcmp.eq.f32.partialorder %v1028_v60, 8.507059e+37 }
 0x4b0   :  { %v1035_v48 = vmul.f32 %v1002_v2, %v953_v4  ;;  %v1005_v49 = vmul.f32 %v1274_v47, %v972_v33  ;;  %vm1010_vm7 = vweird.f32 %v1274_v47 }
 0x4b1   :  { %vm1011_vm9 = vmor %vm1009_vm8, %vm1010_vm7 }
 0x4b2   :  { %1195 = vmatmul.msk.f32.vlgmr.msra.gmra.mxu3 %vm350_vm12, %v1035_v48  ;;  %v1006_v50 = vsub.f32 1.0, %v1005_v49 }
 0x4b3   :  { %v1276_v46 = vpop.eup %1275 }
 0x4b4   :  { %v1007_v52 = vmul.f32 %v1274_v47, %v1006_v50  ;;  %v1020_v54 = vmul.f32 %v1276_v46, %v973_v0  ;;  %vm1025_vm0 = vweird.f32 %v1276_v46 }
 0x4b5   :  { %vm1026_vm11 = vmor %vm1024_vm2, %vm1025_vm0 }
 0x4b6   :  { %v1008_v34 = vadd.f32 %v1274_v47, %v1007_v52  ;;  %v1021_v55 = vsub.f32 1.0, %v1020_v54 }
 0x4b8   :  { %v1012_v56 = vsel %vm1011_vm9, %v1274_v47, %v1008_v34  ;;  %v1022_v59 = vmul.f32 %v1276_v46, %v1021_v55 }
 0x4b9   :  { %v1017_v58 = vsel %vm1014_vm10, %v1016_v35, %v1012_v56 }
 0x4ba   :  { %v1036_v61 = vmul.f32 %v1017_v58, %v1874_v14  ;;  %v1023_v62 = vadd.f32 %v1276_v46, %v1022_v59 }
 0x4bc   :  { %1087 = vmatmul.f32.gmra.mxu1 %v1036_v61  ;;  %v1027_v3 = vsel %vm1026_vm11, %v1276_v46, %v1023_v62 }
 0x4bd   :  { %v1032_v4 = vsel %vm1029_vm13, %v1031_v63, %v1027_v3 }
 0x4be   :  { %v1037_v5 = vmul.f32 %v1032_v4, %v1877_v23 }
 0x4c0   :  { %1196 = vmatmul.msk.f32.gmra.mxu3 %vm350_vm12, %v1037_v5 }
 0x529   :  { %v1085_v7 = vpop.f32.mrf.mxu1 }
 0x52a   :  { %v1086_v8 = vadd.f32 %v1212_v6, %v1085_v7 }
 0x535   :  { %v1108_v9 = vpop.f32.mrf.mxu3 }
 0x536   :  { %v1109_v10 = vadd.f32 %v1108_v9, %v1086_v8 }
 0x538   :  { %1198 = vmatmul.msk.f32.vlgmr.msra.gmra.mxu0 %vm121_vm1, %v1109_v10 }
 0x539   :  { %v1088_v11 = vpop.f32.mrf.mxu1 }
 0x53a   :  { %v1089_v12 = vadd.f32 %v1212_v6, %v1088_v11 }
 0x543   :  { %v1111_v13 = vpop.f32.mrf.mxu3 }
 0x544   :  { %v1112_v14 = vadd.f32 %v1111_v13, %v1089_v12 }
 0x546   :  { %1199 = vmatmul.msk.f32.gmra.mxu0 %vm121_vm1, %v1112_v14 }
 0x5b5   :  { %v1137_v15 = vpop.f32.mrf.mxu0 }
 0x5b6   :  { %1143 = vst.msk [vmem:[%s1912_s15] sm:$0xff] %vm121_vm1, %v1137_v15 }
 0x5c3   :  { %v1140_v16 = vpop.f32.mrf.mxu0 }
 0x5c4   :  { %1144 = vst.msk [vmem:[%s1912_s15 + $0x8] sm:$0xff] %vm121_vm1, %v1140_v16 }
 0x5c5   :  { %1149 = vsyncpa [#allocation3], 1 }
 0x5c6   :  { %1150 = vsyncpa [#allocation5], 1 }
 0x5c7   :  { %1151 = vsyncpa [#allocation8], 1 }

</bundles_post_ra>
